<compile_context>
chip_gen: v7x
topology: tpu7x:2x2x1
jax: 0.10.0
libtpu: 0.0.40
codegen_flags: <defaults>
</compile_context>

<pallas_src>
import functools
import math

import jax
import jax.numpy as jnp
from jax.experimental import pallas as pl
from jax.experimental.pallas import tpu as pltpu


def _fused_block_kernel(*refs, has_skip):
    """Fused (x [+ skip]) -> Linear -> ReLU -> FiLM block."""
    if has_skip:
        (x_ref, skip_ref, cond_ref, wfc_ref, bfc_ref,
         wg_ref, bg_ref, wb_ref, bb_ref, o_ref, g1_sc, bt_sc) = refs
        x = x_ref[0] + skip_ref[0]                       # (TILE_T, d_in)
    else:
        (x_ref, cond_ref, wfc_ref, bfc_ref,
         wg_ref, bg_ref, wb_ref, bb_ref, o_ref, g1_sc, bt_sc) = refs
        x = x_ref[0]                                     # (TILE_T, d_in)

    # gamma / beta depend only on the batch row: compute on the first T tile
    # and keep (1 + gamma), beta in VMEM scratch for the remaining tiles.
    @pl.when(pl.program_id(1) == 0)
    def _():
        cond = cond_ref[0]                               # (1, C)
        gamma = jnp.dot(cond, wg_ref[...],
                        preferred_element_type=jnp.float32) + bg_ref[...]
        beta = jnp.dot(cond, wb_ref[...],
                       preferred_element_type=jnp.float32) + bb_ref[...]
        g1_sc[...] = 1.0 + gamma                         # (1, d_out)
        bt_sc[...] = beta                                # (1, d_out)

    h = jnp.dot(x, wfc_ref[...],
                preferred_element_type=jnp.float32) + bfc_ref[...]
    h = jnp.maximum(h, 0.0)                              # ReLU
    out = g1_sc[...] * h + bt_sc[...]                    # FiLM modulation
    o_ref[0] = out.astype(o_ref.dtype)


def fused_block_pallas(x, cond, wfc_t, bfc, wg_t, bg, wb_t, bb,
                       skip=None, max_tile_t=256):
    """out = (1 + Lg(cond)) * relu(Lfc(x [+ skip])) + Lb(cond).

    Weights must already be transposed: wfc_t (d_in, d_out),
    wg_t / wb_t (cond_dim, d_out); biases are (1, d_out).
    """
    B, T, d_in = x.shape
    d_out = wfc_t.shape[1]
    C = cond.shape[-1]

    # Full T when small; otherwise a multiple of 8 small enough that the
    # double-buffered x/out tiles stay far below v7x's 64 MiB VMEM.
    tile_t = T if T <= max_tile_t else max_tile_t
    grid = (B, pl.cdiv(T, tile_t))

    cond3 = cond.reshape(B, 1, C)   # (B, 1, C): block last-two dims == full dims

    x_spec = pl.BlockSpec((1, tile_t, d_in), lambda b, t: (b, t, 0))
    o_spec = pl.BlockSpec((1, tile_t, d_out), lambda b, t: (b, t, 0))
    cond_spec = pl.BlockSpec((1, 1, C), lambda b, t: (b, 0, 0))

    def resident(arr):  # full-array block, constant index -> fetched once
        return pl.BlockSpec(arr.shape, lambda b, t, _n=arr.ndim: (0,) * _n)

    in_specs = [x_spec]
    args = [x]
    if skip is not None:
        in_specs.append(x_spec)
        args.append(skip)
    in_specs += [cond_spec, resident(wfc_t), resident(bfc),
                 resident(wg_t), resident(bg), resident(wb_t), resident(bb)]
    args += [cond3, wfc_t, bfc, wg_t, bg, wb_t, bb]

    kernel = functools.partial(_fused_block_kernel, has_skip=skip is not None)

    return pl.pallas_call(
        kernel,
        out_shape=jax.ShapeDtypeStruct((B, T, d_out), x.dtype),
        grid_spec=pltpu.PrefetchScalarGridSpec(
            num_scalar_prefetch=0,
            grid=grid,
            in_specs=in_specs,
            out_specs=o_spec,
            scratch_shapes=[pltpu.VMEM((1, d_out), jnp.float32),   # 1 + gamma
                            pltpu.VMEM((1, d_out), jnp.float32)],  # beta
        ),
        compiler_params=pltpu.CompilerParams(
            dimension_semantics=("parallel", "arbitrary"),
            vmem_limit_bytes=48 * 1024 * 1024,
        ),
    )(*args)


def _transpose_block_params(p):
    wfc, bfc, wg, bg, wb, bb = p
    return (wfc.T, bfc, wg.T, bg, wb.T, bb)


def unet_pallas(x, cond, enc_params, dec_params):
    # One-time layout change so the kernels never transpose on the XLU.
    enc_t = [_transpose_block_params(p) for p in enc_params]
    dec_t = [_transpose_block_params(p) for p in dec_params]

    skips = []
    for i, p in enumerate(enc_t):
        x = fused_block_pallas(x, cond, *p)
        if i < len(enc_t) - 1:
            skips.append(x)
    for i, p in enumerate(dec_t):
        skip = skips.pop() if i > 0 else None
        x = fused_block_pallas(x, cond, *p, skip=skip)
    return x


# ---------------- pure-JAX reference (PyTorch semantics) ----------------

def _block_reference(x, cond, wfc, bfc, wg, bg, wb, bb):
    h = jnp.maximum(x @ wfc.T + bfc, 0.0)
    gamma = cond @ wg.T + bg
    beta = cond @ wb.T + bb
    return (1.0 + gamma)[:, None, :] * h + beta[:, None, :]


def unet_reference(x, cond, enc_params, dec_params):
    skips = []
    for i, p in enumerate(enc_params):
        x = _block_reference(x, cond, *p)
        if i < len(enc_params) - 1:
            skips.append(x)
    for i, p in enumerate(dec_params):
        if i > 0:
            x = x + skips.pop()
        x = _block_reference(x, cond, *p)
    return x


# ---------------- deterministic parameter init ----------------

def _init_linear(key, in_dim, out_dim):
    kw, kb = jax.random.split(key)
    bound = 1.0 / math.sqrt(in_dim)
    w = jax.random.uniform(kw, (out_dim, in_dim), minval=-bound, maxval=bound,
                           dtype=jnp.float32)
    b = jax.random.uniform(kb, (1, out_dim), minval=-bound, maxval=bound,
                           dtype=jnp.float32)
    return w, b


def _init_block(key, d_in, d_out, cond_dim):
    k_fc, k_g, k_b = jax.random.split(key, 3)
    wfc, bfc = _init_linear(k_fc, d_in, d_out)
    wg, bg = _init_linear(k_g, cond_dim, d_out)
    wb, bb = _init_linear(k_b, cond_dim, d_out)
    return (wfc, bfc, wg, bg, wb, bb)


if __name__ == "__main__":
    B, T = 2, 8
    input_dim, hidden_dim, cond_dim, depth = 16, 32, 16, 3

    key = jax.random.PRNGKey(0)
    kx, kc, kparams = jax.random.split(key, 3)
    x = jax.random.normal(kx, (B, T, input_dim), dtype=jnp.float32)
    cond = jax.random.normal(kc, (B, cond_dim), dtype=jnp.float32)

    enc_dims = [(input_dim if i == 0 else hidden_dim, hidden_dim)
                for i in range(depth)]
    dec_dims = [(hidden_dim, hidden_dim if i < depth - 1 else input_dim)
                for i in range(depth)]
    block_keys = jax.random.split(kparams, len(enc_dims) + len(dec_dims))
    enc_params = [_init_block(block_keys[i], d_in, d_out, cond_dim)
                  for i, (d_in, d_out) in enumerate(enc_dims)]
    dec_params = [_init_block(block_keys[depth + i], d_in, d_out, cond_dim)
                  for i, (d_in, d_out) in enumerate(dec_dims)]

    out = unet_pallas(x, cond, enc_params, dec_params)
    out = jax.block_until_ready(out)

    ref = unet_reference(x, cond, enc_params, dec_params)
    assert out.shape == (B, T, input_dim), out.shape
    assert jnp.allclose(out, ref, atol=1e-3, rtol=1e-3), \
        float(jnp.max(jnp.abs(out - ref)))

    print("KERNEL_OK")
</pallas_src>

<mosaic_0001>
module attributes {stable_mosaic.version = 11 : i64} {
  func.func @_fused_block_kernel(%arg0: i32, %arg1: i32, %arg2: memref<1x8x16xf32, #tpu.memory_space<vmem>>, %arg3: memref<1x1x16xf32, #tpu.memory_space<vmem>>, %arg4: memref<16x32xf32, #tpu.memory_space<vmem>>, %arg5: memref<1x32xf32, #tpu.memory_space<vmem>>, %arg6: memref<16x32xf32, #tpu.memory_space<vmem>>, %arg7: memref<1x32xf32, #tpu.memory_space<vmem>>, %arg8: memref<16x32xf32, #tpu.memory_space<vmem>>, %arg9: memref<1x32xf32, #tpu.memory_space<vmem>>, %arg10: memref<1x8x32xf32, #tpu.memory_space<vmem>>, %arg11: memref<1x32xf32, #tpu.memory_space<vmem>>, %arg12: memref<1x32xf32, #tpu.memory_space<vmem>>) attributes {dimension_semantics = [#tpu.dimension_semantics<parallel>, #tpu.dimension_semantics<arbitrary>], iteration_bounds = array<i64: 2, 1>, scalar_prefetch = 0 : i64, scratch_operands = 2 : i64, tpu.core_type = #tpu.core_type<tc>, window_params = [{transform_indices = @transform_0, window_bounds = array<i64: 1, 8, 16>}, {transform_indices = @transform_1, window_bounds = array<i64: 1, 1, 16>}, {pipeline_mode = #tpu.pipeline_mode<synchronous>, transform_indices = @transform_2, window_bounds = array<i64: 16, 32>}, {pipeline_mode = #tpu.pipeline_mode<synchronous>, transform_indices = @transform_3, window_bounds = array<i64: 1, 32>}, {pipeline_mode = #tpu.pipeline_mode<synchronous>, transform_indices = @transform_4, window_bounds = array<i64: 16, 32>}, {pipeline_mode = #tpu.pipeline_mode<synchronous>, transform_indices = @transform_5, window_bounds = array<i64: 1, 32>}, {pipeline_mode = #tpu.pipeline_mode<synchronous>, transform_indices = @transform_6, window_bounds = array<i64: 16, 32>}, {pipeline_mode = #tpu.pipeline_mode<synchronous>, transform_indices = @transform_7, window_bounds = array<i64: 1, 32>}, {transform_indices = @transform_8, window_bounds = array<i64: 1, 8, 32>}]} {
    %c0 = arith.constant 0 : index
    %c0_0 = arith.constant 0 : index
    %c0_1 = arith.constant 0 : index
    %0 = vector.load %arg2[%c0, %c0_0, %c0_1] : memref<1x8x16xf32, #tpu.memory_space<vmem>>, vector<1x8x16xf32>
    %1 = vector.shape_cast %0 : vector<1x8x16xf32> to vector<8x16xf32>
    %c0_i32 = arith.constant 0 : i32
    %2 = arith.cmpi eq, %arg1, %c0_i32 : i32
    %3 = arith.extui %2 : i1 to i32
    %c0_i32_2 = arith.constant 0 : i32
    %4 = arith.cmpi ne, %3, %c0_i32_2 : i32
    scf.if %4 {
      %c0_15 = arith.constant 0 : index
      %c0_16 = arith.constant 0 : index
      %c0_17 = arith.constant 0 : index
      %21 = vector.load %arg3[%c0_15, %c0_16, %c0_17] : memref<1x1x16xf32, #tpu.memory_space<vmem>>, vector<1x1x16xf32>
      %22 = vector.shape_cast %21 : vector<1x1x16xf32> to vector<1x16xf32>
      %c0_18 = arith.constant 0 : index
      %c0_19 = arith.constant 0 : index
      %23 = vector.load %arg6[%c0_18, %c0_19] : memref<16x32xf32, #tpu.memory_space<vmem>>, vector<16x32xf32>
      %cst_20 = arith.constant dense<0.000000e+00> : vector<1x32xf32>
      %24 = tpu.matmul %22, %23, %cst_20 {dimension_numbers = #tpu.dot_dimension_numbers<[1], [0], [0], [1], [0, 0, 1, 1], [], []>} : vector<1x16xf32>, vector<16x32xf32>, vector<1x32xf32> -> vector<1x32xf32>
      %c0_21 = arith.constant 0 : index
      %c0_22 = arith.constant 0 : index
      %25 = vector.load %arg7[%c0_21, %c0_22] : memref<1x32xf32, #tpu.memory_space<vmem>>, vector<1x32xf32>
      %26 = arith.addf %24, %25 : vector<1x32xf32>
      %c0_23 = arith.constant 0 : index
      %c0_24 = arith.constant 0 : index
      %27 = vector.load %arg8[%c0_23, %c0_24] : memref<16x32xf32, #tpu.memory_space<vmem>>, vector<16x32xf32>
      %cst_25 = arith.constant dense<0.000000e+00> : vector<1x32xf32>
      %28 = tpu.matmul %22, %27, %cst_25 {dimension_numbers = #tpu.dot_dimension_numbers<[1], [0], [0], [1], [0, 0, 1, 1], [], []>} : vector<1x16xf32>, vector<16x32xf32>, vector<1x32xf32> -> vector<1x32xf32>
      %c0_26 = arith.constant 0 : index
      %c0_27 = arith.constant 0 : index
      %29 = vector.load %arg9[%c0_26, %c0_27] : memref<1x32xf32, #tpu.memory_space<vmem>>, vector<1x32xf32>
      %30 = arith.addf %28, %29 : vector<1x32xf32>
      %cst_28 = arith.constant 1.000000e+00 : f32
      %31 = vector.broadcast %cst_28 : f32 to vector<1x32xf32>
      %32 = arith.addf %31, %26 : vector<1x32xf32>
      %c0_29 = arith.constant 0 : index
      %c0_30 = arith.constant 0 : index
      %33 = vector.load %arg11[%c0_29, %c0_30] : memref<1x32xf32, #tpu.memory_space<vmem>>, vector<1x32xf32>
      tpu.vector_store %arg11[%c0_29, %c0_30], %32 {strides = array<i32>} : memref<1x32xf32, #tpu.memory_space<vmem>>, vector<1x32xf32>,
      %c0_31 = arith.constant 0 : index
      %c0_32 = arith.constant 0 : index
      %34 = vector.load %arg12[%c0_31, %c0_32] : memref<1x32xf32, #tpu.memory_space<vmem>>, vector<1x32xf32>
      tpu.vector_store %arg12[%c0_31, %c0_32], %30 {strides = array<i32>} : memref<1x32xf32, #tpu.memory_space<vmem>>, vector<1x32xf32>,
    } else {
    }
    %c0_3 = arith.constant 0 : index
    %c0_4 = arith.constant 0 : index
    %5 = vector.load %arg4[%c0_3, %c0_4] : memref<16x32xf32, #tpu.memory_space<vmem>>, vector<16x32xf32>
    %cst = arith.constant dense<0.000000e+00> : vector<8x32xf32>
    %6 = tpu.matmul %1, %5, %cst {dimension_numbers = #tpu.dot_dimension_numbers<[1], [0], [0], [1], [0, 0, 1, 1], [], []>} : vector<8x16xf32>, vector<16x32xf32>, vector<8x32xf32> -> vector<8x32xf32>
    %c0_5 = arith.constant 0 : index
    %c0_6 = arith.constant 0 : index
    %7 = vector.load %arg5[%c0_5, %c0_6] : memref<1x32xf32, #tpu.memory_space<vmem>>, vector<1x32xf32>
    %8 = vector.broadcast %7 : vector<1x32xf32> to vector<8x32xf32>
    %9 = arith.addf %6, %8 : vector<8x32xf32>
    %cst_7 = arith.constant 0.000000e+00 : f32
    %10 = vector.broadcast %cst_7 : f32 to vector<8x32xf32>
    %11 = arith.maximumf %9, %10 : vector<8x32xf32>
    %c0_8 = arith.constant 0 : index
    %c0_9 = arith.constant 0 : index
    %12 = vector.load %arg11[%c0_8, %c0_9] : memref<1x32xf32, #tpu.memory_space<vmem>>, vector<1x32xf32>
    %13 = vector.broadcast %12 : vector<1x32xf32> to vector<8x32xf32>
    %14 = arith.mulf %13, %11 : vector<8x32xf32>
    %c0_10 = arith.constant 0 : index
    %c0_11 = arith.constant 0 : index
    %15 = vector.load %arg12[%c0_10, %c0_11] : memref<1x32xf32, #tpu.memory_space<vmem>>, vector<1x32xf32>
    %16 = vector.broadcast %15 : vector<1x32xf32> to vector<8x32xf32>
    %17 = arith.addf %14, %16 : vector<8x32xf32>
    %c0_12 = arith.constant 0 : index
    %c0_13 = arith.constant 0 : index
    %c0_14 = arith.constant 0 : index
    %18 = vector.load %arg10[%c0_12, %c0_13, %c0_14] : memref<1x8x32xf32, #tpu.memory_space<vmem>>, vector<1x8x32xf32>
    %19 = vector.shape_cast %18 : vector<1x8x32xf32> to vector<8x32xf32>
    %20 = vector.shape_cast %17 : vector<8x32xf32> to vector<1x8x32xf32>
    tpu.vector_store %arg10[%c0_12, %c0_13, %c0_14], %20 {strides = array<i32>} : memref<1x8x32xf32, #tpu.memory_space<vmem>>, vector<1x8x32xf32>,
    return
  }
  func.func @transform_0(%arg0: i32, %arg1: i32) -> (i32, i32, i32) {
    %c0_i32 = arith.constant 0 : i32
    %c0_i32_0 = arith.constant 0 : i32
    return %arg0, %arg1, %c0_i32 : i32, i32, i32
  }
  func.func @transform_1(%arg0: i32, %arg1: i32) -> (i32, i32, i32) {
    %c0_i32 = arith.constant 0 : i32
    %c0_i32_0 = arith.constant 0 : i32
    %c0_i32_1 = arith.constant 0 : i32
    return %arg0, %c0_i32, %c0_i32_0 : i32, i32, i32
  }
  func.func @transform_2(%arg0: i32, %arg1: i32) -> (i32, i32) {
    %c0_i32 = arith.constant 0 : i32
    %c0_i32_0 = arith.constant 0 : i32
    %c0_i32_1 = arith.constant 0 : i32
    return %c0_i32, %c0_i32_0 : i32, i32
  }
  func.func @transform_3(%arg0: i32, %arg1: i32) -> (i32, i32) {
    %c0_i32 = arith.constant 0 : i32
    %c0_i32_0 = arith.constant 0 : i32
    %c0_i32_1 = arith.constant 0 : i32
    return %c0_i32, %c0_i32_0 : i32, i32
  }
  func.func @transform_4(%arg0: i32, %arg1: i32) -> (i32, i32) {
    %c0_i32 = arith.constant 0 : i32
    %c0_i32_0 = arith.constant 0 : i32
    %c0_i32_1 = arith.constant 0 : i32
    return %c0_i32, %c0_i32_0 : i32, i32
  }
  func.func @transform_5(%arg0: i32, %arg1: i32) -> (i32, i32) {
    %c0_i32 = arith.constant 0 : i32
    %c0_i32_0 = arith.constant 0 : i32
    %c0_i32_1 = arith.constant 0 : i32
    return %c0_i32, %c0_i32_0 : i32, i32
  }
  func.func @transform_6(%arg0: i32, %arg1: i32) -> (i32, i32) {
    %c0_i32 = arith.constant 0 : i32
    %c0_i32_0 = arith.constant 0 : i32
    %c0_i32_1 = arith.constant 0 : i32
    return %c0_i32, %c0_i32_0 : i32, i32
  }
  func.func @transform_7(%arg0: i32, %arg1: i32) -> (i32, i32) {
    %c0_i32 = arith.constant 0 : i32
    %c0_i32_0 = arith.constant 0 : i32
    %c0_i32_1 = arith.constant 0 : i32
    return %c0_i32, %c0_i32_0 : i32, i32
  }
  func.func @transform_8(%arg0: i32, %arg1: i32) -> (i32, i32, i32) {
    %c0_i32 = arith.constant 0 : i32
    %c0_i32_0 = arith.constant 0 : i32
    return %arg0, %arg1, %c0_i32 : i32, i32, i32
  }
}

</mosaic_0001>

<bundles_post_ra>
// kernel: tpu_custom_call.1
= control target key start
LH: loop header
LB: loop body
LE: loop exit
PB: predicated region body
PF: predicated region fallthrough
CT: control target
= control target key end

     0   :  { %s1424_s0 = inlined_call_operand.hbm [shape: f32[2,8,16], index: 0, kind: input, shape index: {}]   ;;  %s1425_s1 = inlined_call_operand.vmem [shape: f32[2,1,16], index: 1, kind: input, shape index: {}]   ;;  %s1426_s2 = inlined_call_operand.hbm [shape: f32[16,32], index: 2, kind: input, shape index: {}]   ;;  %s1427_s3 = inlined_call_operand.vmem [shape: f32[1,32], index: 3, kind: input, shape index: {}]   ;;  %s1428_s4 = inlined_call_operand.hbm [shape: f32[16,32], index: 4, kind: input, shape index: {}]   ;;  %s1429_s5 = inlined_call_operand.vmem [shape: f32[1,32], index: 5, kind: input, shape index: {}]   ;;  %s1430_s6 = inlined_call_operand.vmem [shape: f32[16,32], index: 6, kind: input, shape index: {}]   ;;  %s1431_s7 = inlined_call_operand.vmem [shape: f32[1,32], index: 7, kind: input, shape index: {}]   ;;  %s1432_s8 = inlined_call_operand.hbm [shape: f32[2,8,32], index: 8, kind: output, shape index: {}]  }
   0x1   :  { %1440 = sst [smem:[#allocation16_spill]] %s1432_s8 }
   0x2   :  { %13 = vsyncpa [#allocation5], 0 }
   0x3   :  { %15 = vsyncpa [#allocation5 + $0x1], 0 }
   0x4   :  { %16 = vsyncpa [#allocation8], 0 }
   0x5   :  { %17 = vsyncpa [#allocation6], 0 }
   0x6   :  { %19 = vsyncpa [#allocation6 + $0x1], 0  ;;  %s1144_s27 = smov 0   ;;  %s1146_s28 = smov 0  }
   0x7   :  { %s1148_s29 = smov 0   ;;  %s1150_s30 = smov 0  }
   0x8   :  { %s1152_s9 = smov 0   ;;  %s1154_s10 = smov 0  }
   0x9 LB: > { %1441 = sst [smem:[#allocation14_spill]] %s1068_s27  ;;  %s766_s11 = sadd.s32 4294967295, %s1088_s10   ;;  %s1088_s10 = sphi %s1154_s10, %s25_s10   ;;  %s1084_s9 = sphi %s1152_s9, %s1464_s9   ;;  %s1080_s30 = sphi %s1150_s30, %s1463_s30   ;;  %s1076_s29 = sphi %s1148_s29, %s1462_s29   ;;  %s1072_s28 = sphi %s1146_s28, %s1461_s28   ;;  %s1068_s27 = sphi %s1144_s27, %s1460_s27  }
   0xa   : > { %s767_s12 = sadd.s32 4294967294, %s1088_s10   ;;  %p59_p0 = scmp.ne.s32.totalorder %s1072_s28, %s1068_s27 }
   0xb   : > { %p1178_p1 = scmp.eq.s32.totalorder %s766_s11, 0  ;;  %p1182_p2 = scmp.eq.s32.totalorder %s766_s11, 1 }
   0xc   : > { %p243_p3 = scmp.eq.s32.totalorder %s767_s12, 1  ;;  %p768_p5 = scmp.ge.s32.totalorder %s1088_s10, 1 }
   0xd   : > { %s1442_s13 = scalar_select %p1178_p1, 1, 0 }
   0xe   : > { %p1188_p4 = por %p1178_p1, %p59_p0  ;;  %p1193_p6 = por %p243_p3, %p59_p0 }
   0xf   : > { %p250_p7 = scmp.lt.s32.totalorder %s1088_s10, 3  ;;  %s1090_s18 = smov [#allocation7]  }
  0x10   : > { %s1444_s15 = scalar_select %p1188_p4, 1, 0 }
  0x11   : > { %s1445_s16 = scalar_select %p1193_p6, 1, 0 }
  0x12   : > { %p1198_p8 = pnand %p768_p5, %p250_p7  ;;  %s262_s19 = sshll.u32 %s1090_s18, 4  ;;  %s1202_s19 = int_to_ptr.vmem [resolvable:$true] %s262_s19 }
  0x13   : > { %1446 = sst [smem:[#allocation15_spill]] %s1445_s16  ;;  %s1091_s21 = smov [#allocation9]  }
  0x14   : > { %p840_p9 = pneg %p1198_p8  ;;  %s278_s22 = sshll.u32 %s1091_s21, 4  ;;  %s1213_s22 = int_to_ptr.vmem [resolvable:$true] %s278_s22 }
  0x15   : > { %s916_s25 = scalar_lea.hbm %s1426_s2, 256 }
  0x16   : > { %p1209_p11 = pnand %p840_p9, %p1178_p1  ;;  %p917_p12 = scmp.ne.s32.totalorder %s1426_s2, %s916_s25 }
  0x17   : > { %p923_p5 = scmp.lt.u32.totalorder %s916_s25, %s1426_s2 }
  0x18   : > { %p918_p13 = pneg %p1209_p11 }
  0x1a   : > { %p919_p0 = pnand %p918_p13, %p917_p12 }
  0x1c   : > { %p920_p3 = pneg %p919_p0 }
  0x1e   : > { %p925_p7 = pnand %p923_p5, %p920_p3 }
  0x20   : > { %928 = shalt.err (!%p925_p7)
}
  0x21   : > { %s929_s21 = scalar_lea.vmem %s1202_s19, 256  ;;  %p937_p1 = scmp.lt.s32.totalorder %s1202_s19, %s1202_s19 }
  0x22   : > { %p930_p9 = scmp.ne.s32.totalorder %s1202_s19, %s929_s21  ;;  %p938_p12 = scmp.lt.s32.totalorder %s929_s21, %s929_s21 }
  0x24   : > { %p932_p10 = pnand %p930_p9, %p918_p13  ;;  %p939_p0 = por %p938_p12, %p937_p1 }
  0x26   : > { %p933_p6 = pneg %p932_p10 }
  0x28   : > { %p940_p4 = pnand %p939_p0, %p933_p6 }
  0x2a   : > { %943 = shalt.err (!%p940_p4)
}
  0x2b   : > { %s1092_s23 = smov 128   ;;  %s1093_s24 = smov 8  }
  0x2c   : > { %843 = dma.hbm_to_vmem [thread:$0]  (!%p1209_p11), %s1426_s2, 256, %s1202_s19, [#allocation8], %s1092_s23, %s1092_s23, %s1093_s24  }
  0x2d   : > { %s944_s18 = scalar_lea.hbm %s1428_s4, 256 }
  0x2e   : > { %p945_p1 = scmp.ne.s32.totalorder %s1428_s4, %s944_s18  ;;  %p951_p10 = scmp.lt.u32.totalorder %s944_s18, %s1428_s4 }
  0x30   : > { %p947_p4 = pnand %p945_p1, %p918_p13 }
  0x32   : > { %p948_p6 = pneg %p947_p4 }
  0x34   : > { %p953_p3 = pnand %p951_p10, %p948_p6 }
  0x36   : > { %956 = shalt.err (!%p953_p3)
}
  0x37   : > { %s957_s19 = scalar_lea.vmem %s1213_s22, 256  ;;  %p965_p12 = scmp.lt.s32.totalorder %s1213_s22, %s1213_s22 }
  0x38   : > { %p958_p5 = scmp.ne.s32.totalorder %s1213_s22, %s957_s19  ;;  %p966_p0 = scmp.lt.s32.totalorder %s957_s19, %s957_s19 }
  0x3a   : > { %p960_p7 = pnand %p958_p5, %p918_p13  ;;  %p967_p1 = por %p966_p0, %p965_p12 }
  0x3c   : > { %p961_p9 = pneg %p960_p7 }
  0x3e   : > { %p968_p4 = pnand %p967_p1, %p961_p9 }
  0x40   : > { %971 = shalt.err (!%p968_p4)
}
  0x41   : > { %846 = dma.hbm_to_vmem [thread:$0]  (!%p1209_p11), %s1428_s4, 256, %s1213_s22, [#allocation8], %s1092_s23, %s1092_s23, %s1093_s24  }
  0x42   : > { %s37_s16 = sadd.s32 1, %s1084_s9  ;;  %s46_s25 = sadd.s32 1, %s1076_s29 }
  0x43   : > { %p39_p13 = scmp.ge.s32.totalorder %s37_s16, 2  ;;  %p53_p6 = scmp.ne.s32.totalorder %s1076_s29, %s1072_s28 }
  0x44   : > { %p54_p10 = scmp.eq.s32.totalorder %s1088_s10, 0  ;;  %p857_p3 = scmp.lt.s32.totalorder %s1088_s10, 2 }
  0x45   : > { %s1466_s16 = smov (%p39_p13, %s37_s16), 0  ;;  %p1277_p7 = por %p1182_p2, %p53_p6 }
  0x46   : > { %p55_p5 = por %p54_p10, %p53_p6  ;;  %s41_s26 = ssub.s32 %s1084_s9, %s1466_s16 }
  0x47   : > { %s1449_s20 = scalar_select %p1277_p7, 1, 0 }
  0x48   : > { %s301_s11 = sand.u32 1, %s1076_s29   ;;  %p44_p9 = scmp.eq.s32.totalorder %s41_s26, 0 }
  0x49   : > { %s772_s22 = sshll.u32 %s301_s11, 3  ;;  %s773_s23 = sshll.u32 %s1084_s9, 7 }
  0x4a   : > { %s1286_s24 = scalar_select %p44_p9, %s1076_s29, %s46_s25  }
  0x4b   : > { %s1291_s21 = scalar_lea.hbm %s1424_s0, %s773_s23  ;;  %s305_s14 = scalar_lea.vmem [#allocation4], %s772_s22 }
  0x4c   : > { %s313_s19 = sshll.u32 %s305_s14, 4  ;;  %p1295_p2 = pnand %p857_p3, %p55_p5  ;;  %s1299_s19 = int_to_ptr.vmem [resolvable:$true] %s313_s19 }
  0x4d   : > { %s302_s27 = scalar_lea.sflag [#allocation5], %s301_s11  ;;  %s972_s25 = scalar_lea.hbm %s1291_s21, 128 }
  0x4e   : > { %p973_p11 = scmp.ne.s32.totalorder %s1291_s21, %s972_s25  ;;  %p974_p12 = pneg %p1295_p2 }
  0x4f   : > { %s977_s23 = scalar_lea.hbm %s1424_s0, 256  ;;  %p978_p4 = scmp.lt.u32.totalorder %s1291_s21, %s1424_s0 }
  0x50   : > { %p975_p0 = pnand %p974_p12, %p973_p11  ;;  %p979_p13 = scmp.lt.u32.totalorder %s977_s23, %s972_s25 }
  0x51   : > { %p981_p10 = scmp.lt.u32.totalorder %s972_s25, %s1291_s21 }
  0x52   : > { %p976_p1 = pneg %p975_p0  ;;  %p980_p6 = por %p979_p13, %p978_p4 }
  0x54   : > { %p982_p3 = por %p981_p10, %p980_p6 }
  0x56   : > { %p983_p5 = pnand %p982_p3, %p976_p1 }
  0x58   : > { %986 = shalt.err (!%p983_p5)
}
  0x59   : > { %s987_s11 = scalar_lea.vmem %s1299_s19, 128  ;;  %s1094_s14 = smov [#allocation4]  }
  0x5a   : > { %p988_p9 = scmp.ne.s32.totalorder %s1299_s19, %s987_s11  ;;  %s992_s26 = sshll.u32 %s1094_s14, 4  ;;  %s993_s26 = int_to_ptr.vmem [resolvable:$false] %s992_s26 }
  0x5b   : > { %s994_s22 = scalar_lea.vmem %s993_s26, 256  ;;  %p995_p7 = scmp.lt.s32.totalorder %s1299_s19, %s993_s26 }
  0x5c   : > { %p990_p11 = pnand %p988_p9, %p974_p12  ;;  %p996_p4 = scmp.lt.s32.totalorder %s994_s22, %s987_s11 }
  0x5e   : > { %p991_p0 = pneg %p990_p11  ;;  %p997_p13 = por %p996_p4, %p995_p7 }
  0x60   : > { %p998_p6 = pnand %p997_p13, %p991_p0 }
  0x62   : > { %1001 = shalt.err (!%p998_p6)
}
  0x63   : > { %850 = dma.hbm_to_vmem [thread:$0]  (!%p1295_p2), %s1291_s21, 128, %s1299_s19, %s302_s27  }
  0x64   : > { %328 = sbr.rel (%p1198_p8) target bundleno = 360 (0x168), region = 52  ;;  %s1329_s25 = sand.u32 (!%p1198_p8), 1, %s1072_s28  }
  0x65   : > { %s775_s23 = sshll.u32 (!%p1198_p8), %s1329_s25, 3  ;;  %s331_s12 = scalar_lea.sflag (!%p1198_p8), [#allocation5], %s1329_s25 }
  0x66   : > { %s1335_s18 = scalar_lea.vmem (!%p1198_p8), [#allocation4], %s775_s23  ;;  %p1451_p7 = scmp.ne.s32.totalorder (!%p1198_p8), %s1444_s15, 0 }
  0x6b   : > { %1055 = dma.done.wait (%p1451_p7), %s331_s12, 128  }
  0x6c   : > { %1057 = vsyncadd (%p1451_p7), %s331_s12, 4294967168  ;;  %p1452_p2 = scmp.ne.s32.totalorder %s1442_s13, 0 }
  0x6e   : > { %1059 = dma.done.wait (%p1452_p2), [#allocation8], 512  }
  0x6f   : > { %1061 = vsyncadd (%p1452_p2), [#allocation8], 4294966784  ;;  %p378_p8 = scmp.lt.s32.totalorder %s1080_s30, 1  ;;  %v1095_v0 = vmov 0.0|0.0   ;;  %vm1096_vm0 = vmmov 0   ;;  %v1097_v1 = vmov 0.0  }
  0x70   : > { %819 = vmatprep.subr.bf16.mxu0 %v1095_v0  ;;  %802 = vmatprep.mubr.msk.f32.mxu0 %vm1096_vm0, %v1097_v1  ;;  %v387_v2 = vld [vmem:[#allocation9] sm:$0xff]  ;;  %v388_v3 = vld [vmem:[#allocation9 + $0x8] sm:$0xff]  ;;  %v541_v7 = vld [vmem:[#allocation7] sm:$0xff]  ;;  %vm390_vm1 = vcmask 130048   ;;  %vm538_vm2 = vcmask 253952   ;;  %s786_s17 = sshll.u32 %s1080_s30, 7 }
  0x71   : > { %822 = vmatprep.subr.bf16.mxu1 %v1095_v0  ;;  %809 = vmatprep.mubr.msk.f32.mxu1 %vm1096_vm0, %v1097_v1  ;;  %s379_s15 = scalar_select %p378_p8, %s1080_s30, 1  ;;  %v820_v4 = vpack.c.bf16 %v388_v3, %v387_v2  ;;  %v464_v5 = vld [vmem:[%s1430_s6] sm:$0xff]  ;;  %v465_v6 = vld [vmem:[%s1430_s6 + $0x8] sm:$0xff]  ;;  %vm641_vm3 = vcmask 261120  }
  0x72   : > { %v823_v8 = vpack.c.bf16 %v465_v6, %v464_v5  ;;  %v542_v9 = vld [vmem:[#allocation7 + $0x8] sm:$0xff]  ;;  %v381_v12 = vld [vmem:[%s1335_s18] sm:$0xff]  ;;  %s377_s21 = scalar_lea.vmem [#allocation10], %s775_s23  ;;  %s1453_s27 = sld [smem:[#allocation16_spill]] }
  0x73   : > { %s380_s13 = scalar_lea.vmem %s1425_s1, %s379_s15  ;;  %821 = vmatpush3.bf16.msra.mxu0 %v820_v4  ;;  %v826_v11 = vpack.c.bf16 %v542_v9, %v541_v7  ;;  %v389_v13 = vld [vmem:[%s1429_s5] sm:$0x1]  ;;  %s644_s26 = scalar_lea.sflag [#allocation6], %s1329_s25 }
  0x74   : > { %v386_v10 = vld [vmem:[%s380_s13] sm:$0x1]  ;;  %824 = vmatpush3.bf16.msra.mxu1 %v823_v8  ;;  %825 = vmatprep.subr.bf16.mxu0 %v1095_v0  ;;  %s658_s13 = sshll.u32 %s377_s21, 4  ;;  %p1455_p1 = scmp.ne.s32.totalorder %s1449_s20, 0  ;;  %s1377_s13 = int_to_ptr.vmem [resolvable:$true] %s658_s13 }
  0x75   : > { %v466_v14 = vld [vmem:[%s1431_s7] sm:$0x1]  ;;  %s1002_s22 = scalar_lea.vmem %s1377_s13, 128  ;;  %s1098_s30 = smov [#allocation10]  }
  0x76   : > { %803 = vmatmul.mubr.msk.f32.vlgmr.msra.gmra.mrb[0].mxu0 %vm390_vm1, %v386_v10  ;;  %v781_v21 = vld [vmem:[%s1427_s3] ss:$0 sm:$0xff]  ;;  %p1003_p12 = scmp.ne.s32.totalorder %s1377_s13, %s1002_s22  ;;  %s1006_s23 = sshll.u32 %s1098_s30, 4  ;;  %s1007_s23 = int_to_ptr.vmem [resolvable:$false] %s1006_s23 }
  0x77   : > { %810 = vmatmul.mubr.msk.f32.vlgmr.msra.gmra.mrb[0].mxu1 %vm390_vm1, %v386_v10  ;;  %827 = vmatpush3.bf16.msra.mxu0 %v826_v11  ;;  %s1008_s12 = scalar_lea.vmem %s1007_s23, 256  ;;  %p1009_p5 = scmp.lt.s32.totalorder %s1377_s13, %s1007_s23 }
  0x78   : > { %816 = vmatprep.mubr.msk.f32.mxu0 %vm1096_vm0, %v1097_v1  ;;  %s1454_s11 = smov %s1453_s27  ;;  %s1375_s14 = scalar_lea.hbm %s1453_s27, %s786_s17 }
  0x79   : > { %p1004_p10 = pnand %p1003_p12, %p1455_p1  ;;  %p1010_p9 = scmp.lt.s32.totalorder %s1008_s12, %s1002_s22 }
  0x7a   : > { %817 = vmatmul.mubr.msk.f32.vlgmr.msra.gmra.mrb[2].mxu0 %vm390_vm1, %v381_v12 }
  0x7b   : > { %p1005_p3 = pneg %p1004_p10  ;;  %p1011_p11 = por %p1010_p9, %p1009_p5 }
  0x7d   : > { %p1012_p0 = pnand %p1011_p11, %p1005_p3 }
 0x149   : > { %v460_v15 = vpop.f32.mrb[0].mxu0 }
 0x14a   : > { %v461_v16 = vadd.f32 %v460_v15, %v389_v13  ;;  %v804_v17 = vpop.f32.mrb[1].mxu0  ;;  %v533_v18 = vpop.f32.mrb[0].mxu1 }
 0x14b   : > { %v534_v19 = vadd.f32 %v533_v18, %v466_v14  ;;  %v811_v20 = vpop.f32.mrb[1].mxu1 }
 0x14c   : > { %v537_v22 = vadd.f32 1.0, %v461_v16 }
 0x14d   : > { %540 = vst.msk [vmem:[#allocation3] sm:$0x1] %vm538_vm2, %v534_v19  ;;  %v620_v23 = vpop.f32.mrb[2].mxu0 }
 0x14e   : > { %539 = vst.msk [vmem:[#allocation2] sm:$0x1] %vm538_vm2, %v537_v22  ;;  %v621_v24 = vadd.f32 %v781_v21, %v620_v23  ;;  %v818_v25 = vpop.f32.mrb[3].mxu0 }
 0x150   : > { %v624_v26 = vmax.f32 %v621_v24, 0.0 }
 0x154   : > { %v784_v28 = vld [vmem:[#allocation3] ss:$0 sm:$0xff] }
 0x155   : > { %v783_v27 = vld [vmem:[#allocation2] ss:$0 sm:$0xff] }
 0x156   : > { %v632_v29 = vmul.f32 %v783_v27, %v624_v26 }
 0x158   : > { %v640_v30 = vadd.f32 %v784_v28, %v632_v29 }
 0x15a   : > { %642 = vst.msk [vmem:[%s377_s21] sm:$0xff] %vm641_vm3, %v640_v30 }
 0x15b   : > { %1015 = shalt.err (!%p1012_p0)
}
 0x15c   : > { %s1016_s25 = scalar_lea.hbm %s1375_s14, 128  ;;  %s1020_s17 = scalar_lea.hbm %s1454_s11, 256 }
 0x15d   : > { %p1017_p4 = scmp.ne.s32.totalorder %s1375_s14, %s1016_s25  ;;  %p1021_p7 = scmp.lt.u32.totalorder %s1375_s14, %s1454_s11 }
 0x15e   : > { %p1022_p2 = scmp.lt.u32.totalorder %s1020_s17, %s1016_s25  ;;  %p1024_p12 = scmp.lt.u32.totalorder %s1016_s25, %s1375_s14 }
 0x15f   : > { %p1018_p13 = pnand %p1017_p4, %p1455_p1 }
 0x160   : > { %p1023_p8 = por %p1022_p2, %p1021_p7 }
 0x161   : > { %p1019_p6 = pneg %p1018_p13 }
 0x162   : > { %p1025_p10 = por %p1024_p12, %p1023_p8 }
 0x164   : > { %p1026_p3 = pnand %p1025_p10, %p1019_p6 }
 0x166   : > { %1029 = shalt.err (!%p1026_p3)
}
 0x167   : > { %838 = dma.vmem_to_hbm [thread:$0]  (%p1455_p1), %s1377_s13, 128, %s1375_s14, %s644_s26  }
 0x168 PF: > { %s1456_s8 = sld [smem:[#allocation14_spill]]  ;;  %s1457_s27 = sld [smem:[#allocation15_spill]] }
 0x169   : > { %p1459_p9 = scmp.ge.s32.totalorder %s1088_s10, 2 }
 0x16e   : > { %s670_s22 = sand.u32 1, %s1456_s8   ;;  %p1458_p5 = scmp.ne.s32.totalorder %s1457_s27, 0 }
 0x16f   : > { %s671_s30 = scalar_lea.sflag [#allocation6], %s670_s22 }
 0x170   : > { %p852_p11 = pnand %p1459_p9, %p1458_p5 }
 0x172   : > { %1063 = dma.done.wait (!%p852_p11), %s671_s30, 128  }
 0x173   : > { %1065 = vsyncadd (!%p852_p11), %s671_s30, 4294967168  ;;  %s25_s10 = sadd.s32 1, %s1088_s10   ;;  %s1460_s27 = smov %s1072_s28 }
 0x174   : > { %p22_p0 = scmp.ge.s32.totalorder %s25_s10, 4   ;;  %s1461_s28 = smov %s1076_s29 }
 0x175   : > { %s1462_s29 = smov %s1286_s24  ;;  %s1463_s30 = smov %s1084_s9 }
 0x176   : > { %s1464_s9 = smov %s1466_s16  ;;  %24 = sbr.rel (!%p22_p0) target bundleno = 9 (0x9), region = 112 }
 0x17d   :  { %676 = vsyncpa [#allocation5], 1 }
 0x17e   :  { %678 = vsyncpa [#allocation5 + $0x1], 1 }
 0x17f   :  { %679 = vsyncpa [#allocation8], 1 }
 0x180   :  { %680 = vsyncpa [#allocation6], 1 }
 0x181   :  { %682 = vsyncpa [#allocation6 + $0x1], 1 }

</bundles_post_ra>
